<compile_context>
chip_gen: v6e
topology: v6e:2x2x1
jax: 0.10.0
libtpu: 0.0.40
codegen_flags: <defaults>
</compile_context>

<pallas_src>
import math

import jax
import jax.numpy as jnp
from jax.experimental import pallas as pl
from jax.experimental.pallas import tpu as pltpu


def _sublane_pack(dtype) -> int:
    """Sublane packing factor: 8 rows/vreg for 32-bit, 16 for 16-bit, 32 for 8-bit."""
    itemsize = jnp.dtype(dtype).itemsize
    return max(8, 32 // max(1, itemsize))


def _lane_dense_shape(n_elems: int, last_dim: int, leading: int,
                      max_lane: int = 32768):
    """Pick a lane-dense 2-D factorization (rows, cols) of n_elems.

    cols = largest multiple of 128 that divides n_elems and is <= max_lane.
    Falls back to the natural (leading, last_dim) split when no such factor
    exists (n_elems not a multiple of 128)."""
    if n_elems > 0 and n_elems % 128 == 0:
        lim = min(n_elems, max_lane)
        lim -= lim % 128
        for cols in range(lim, 127, -128):
            if n_elems % cols == 0:
                return (n_elems // cols, cols)
    return (leading, last_dim)


def _make_dma_copy_kernel(starts, sizes):
    """Kernel body: issue one HBM->HBM DMA per (static) chunk, then wait all."""
    n_chunks = len(starts)

    def kernel(x_hbm, o_hbm, sem):
        copies = []
        for i in range(n_chunks):                     # static Python loop
            cp = pltpu.make_async_copy(
                x_hbm.at[pl.ds(starts[i], sizes[i]), :],
                o_hbm.at[pl.ds(starts[i], sizes[i]), :],
                sem.at[i],
            )
            cp.start()
            copies.append(cp)
        for cp in copies:
            cp.wait()

    return kernel


def _dma_copy_2d(x2d, *, max_outstanding: int = 4,
                 min_chunk_bytes: int = 1 << 20):
    """Direct HBM->HBM copy of a 2-D array via chunked async DMA (no VMEM bounce)."""
    R, C = x2d.shape
    itemsize = jnp.dtype(x2d.dtype).itemsize
    total_bytes = R * C * itemsize
    pack = _sublane_pack(x2d.dtype)

    # Enough outstanding DMAs to saturate HBM BW on large copies, but keep each
    # chunk at least ~min_chunk_bytes so per-descriptor overhead stays negligible.
    n_chunks = int(max(1, min(max_outstanding,
                              total_bytes // max(1, min_chunk_bytes),
                              R)))

    base = R // n_chunks
    if n_chunks > 1 and base >= pack:
        base -= base % pack                           # dtype-packed row multiple
    starts, sizes = [], []
    s = 0
    for i in range(n_chunks):
        sz = (R - s) if i == n_chunks - 1 else base
        starts.append(s)
        sizes.append(sz)
        s += sz

    kernel = _make_dma_copy_kernel(starts, sizes)

    return pl.pallas_call(
        kernel,
        out_shape=jax.ShapeDtypeStruct((R, C), x2d.dtype),
        in_specs=[pl.BlockSpec(memory_space=pl.ANY)],     # raw HBM ref
        out_specs=pl.BlockSpec(memory_space=pl.ANY),      # raw HBM ref
        scratch_shapes=[pltpu.SemaphoreType.DMA((n_chunks,))],
        compiler_params=pltpu.CompilerParams(has_side_effects=True),
        cost_estimate=pl.CostEstimate(
            flops=0, transcendentals=0, bytes_accessed=2 * total_bytes),
    )(x2d)


def reshape_module_forward(x, dim: int = 2, use_kernel: bool = False,
                           max_outstanding: int = 4,
                           min_chunk_bytes: int = 1 << 20,
                           max_lane: int = 32768):
    """Equivalent of ReshapeModule(dim).forward(x) == torch.squeeze(x, dim).

    Production path (use_kernel=False, default): jnp.squeeze — metadata-only,
    zero HBM traffic.  The Pallas path is an opt-in layout/fusion anchor that
    performs an explicit HBM->HBM DMA copy of the squeezed view.
    """
    if x.shape[dim] != 1:
        # torch.squeeze on a non-singleton dim is a no-op.
        return x

    out_shape = x.shape[:dim] + x.shape[dim + 1:]

    if not use_kernel:
        return jnp.squeeze(x, axis=dim)

    n = int(math.prod(out_shape)) if len(out_shape) > 0 else 1
    if n == 0 or len(out_shape) == 0:
        # Degenerate (empty / scalar) outputs: no DMA worth issuing.
        return jnp.squeeze(x, axis=dim)

    last = out_shape[-1]
    leading = int(math.prod(out_shape[:-1])) if len(out_shape) > 1 else 1
    flat = _lane_dense_shape(n, last, leading, max_lane=max_lane)

    # Row-major contiguous reshape => free metadata reshape in XLA.
    y2d = _dma_copy_2d(x.reshape(flat),
                       max_outstanding=max_outstanding,
                       min_chunk_bytes=min_chunk_bytes)
    return y2d.reshape(out_shape)


if __name__ == "__main__":
    key = jax.random.PRNGKey(0)

    # SEANet-style input: (batch, channels, 1, time)
    B, C, T = 2, 4, 16
    x = jax.random.normal(key, (B, C, 1, T), dtype=jnp.float32)
    y_ref = jnp.squeeze(x, axis=2)

    # Default (zero-cost) path.
    y_fast = jax.block_until_ready(reshape_module_forward(x, dim=2))
    # Pallas DMA-copy path (N=128 -> lane-dense (1, 128), single DMA).
    y_kern = jax.block_until_ready(
        reshape_module_forward(x, dim=2, use_kernel=True))

    assert y_fast.shape == (B, C, T) and y_kern.shape == (B, C, T)
    assert y_fast.dtype == x.dtype and y_kern.dtype == x.dtype
    assert bool(jnp.array_equal(y_fast, y_ref))
    assert bool(jnp.array_equal(y_kern, y_ref))

    # Larger case exercising multiple outstanding DMA chunks:
    # N = 32768 -> lane-dense (32, 1024); 4 chunks of (8, 1024) f32 each.
    x2 = jax.random.normal(jax.random.PRNGKey(0), (2, 64, 1, 256),
                           dtype=jnp.float32)
    y2 = jax.block_until_ready(
        reshape_module_forward(x2, dim=2, use_kernel=True,
                               min_chunk_bytes=16 * 1024, max_lane=1024))
    assert bool(jnp.array_equal(y2, jnp.squeeze(x2, axis=2)))

    # bf16 case hitting the non-128-multiple fallback flatten (leading, last).
    x3 = jax.random.normal(jax.random.PRNGKey(1), (2, 3, 1, 5),
                           dtype=jnp.bfloat16)
    y3 = jax.block_until_ready(
        reshape_module_forward(x3, dim=2, use_kernel=True))
    assert y3.shape == (2, 3, 5) and y3.dtype == x3.dtype
    assert bool(jnp.array_equal(y3, jnp.squeeze(x3, axis=2)))

    # No-op case: squeezing a non-singleton dim returns the input unchanged.
    x4 = jax.random.normal(jax.random.PRNGKey(2), (2, 4, 3, 16),
                           dtype=jnp.float32)
    y4 = reshape_module_forward(x4, dim=2)
    assert y4.shape == x4.shape and bool(jnp.array_equal(y4, x4))

    print("KERNEL_OK")
</pallas_src>

<mosaic_0001>
module attributes {stable_mosaic.version = 11 : i64} {
  func.func @kernel(%arg0: memref<1x128xf32, #tpu.memory_space<any>>, %arg1: memref<1x128xf32, #tpu.memory_space<any>>, %arg2: memref<1x!tpu.dma_semaphore, #tpu.memory_space<semaphore_mem>>) attributes {dimension_semantics = [], scalar_prefetch = 0 : i64, scratch_operands = 1 : i64, tpu.core_type = #tpu.core_type<tc>} {
    %c0_i32 = arith.constant 0 : i32
    %c0_i32_0 = arith.constant 0 : i32
    %c0_i32_1 = arith.constant 0 : i32
    %0 = tpu.memref_slice %arg0[%c0_i32_0, %c0_i32_1] : memref<1x128xf32, #tpu.memory_space<any>> -> memref<1x128xf32, #tpu.memory_space<any>>
    %c0_i32_2 = arith.constant 0 : i32
    %c0_i32_3 = arith.constant 0 : i32
    %1 = tpu.memref_slice %arg1[%c0_i32_2, %c0_i32_3] : memref<1x128xf32, #tpu.memory_space<any>> -> memref<1x128xf32, #tpu.memory_space<any>>
    %2 = tpu.memref_slice %arg2[%c0_i32] : memref<1x!tpu.dma_semaphore, #tpu.memory_space<semaphore_mem>> -> memref<1x!tpu.dma_semaphore, #tpu.memory_space<semaphore_mem>>
    %3 = tpu.memref_squeeze %2 : memref<1x!tpu.dma_semaphore, #tpu.memory_space<semaphore_mem>> -> memref<!tpu.dma_semaphore, #tpu.memory_space<semaphore_mem>>
    tpu.enqueue_dma source(%0 : memref<1x128xf32, #tpu.memory_space<any>>) target(%1 : memref<1x128xf32, #tpu.memory_space<any>>) target_semaphore(%3 : memref<!tpu.dma_semaphore, #tpu.memory_space<semaphore_mem>>)
    %c0_i32_4 = arith.constant 0 : i32
    %c0_i32_5 = arith.constant 0 : i32
    %c0_i32_6 = arith.constant 0 : i32
    %4 = tpu.memref_slice %arg0[%c0_i32_5, %c0_i32_6] : memref<1x128xf32, #tpu.memory_space<any>> -> memref<1x128xf32, #tpu.memory_space<any>>
    %c0_i32_7 = arith.constant 0 : i32
    %c0_i32_8 = arith.constant 0 : i32
    %5 = tpu.memref_slice %arg1[%c0_i32_7, %c0_i32_8] : memref<1x128xf32, #tpu.memory_space<any>> -> memref<1x128xf32, #tpu.memory_space<any>>
    %6 = tpu.memref_slice %arg2[%c0_i32_4] : memref<1x!tpu.dma_semaphore, #tpu.memory_space<semaphore_mem>> -> memref<1x!tpu.dma_semaphore, #tpu.memory_space<semaphore_mem>>
    %7 = tpu.memref_squeeze %6 : memref<1x!tpu.dma_semaphore, #tpu.memory_space<semaphore_mem>> -> memref<!tpu.dma_semaphore, #tpu.memory_space<semaphore_mem>>
    tpu.wait_dma2 semaphore(%7 : memref<!tpu.dma_semaphore, #tpu.memory_space<semaphore_mem>>) src(%4 : memref<1x128xf32, #tpu.memory_space<any>>) dst(%5 : memref<1x128xf32, #tpu.memory_space<any>>)
    return
  }
}

</mosaic_0001>

<bundles_post_ra>
// kernel: tpu_custom_call.1
= control target key start
LH: loop header
LB: loop body
LE: loop exit
PB: predicated region body
PF: predicated region fallthrough
CT: control target
= control target key end

     0   :  { %s28_s6 = smov [#allocation2]   ;;  %s29_s7 = smov 131072   ;;  %s47_s0 = inlined_call_operand.hbm [shape: f32[1,128], index: 0, kind: input, shape index: {}]   ;;  %s48_s1 = inlined_call_operand.hbm [shape: f32[1,128], index: 1, kind: output, shape index: {}]  }
   0x1   :  { %s30_s8 = smov 0  }
   0x2   :  { %12 = dma.general %s47_s0, 16, %s48_s1, %s28_s6, %s29_s7, [#allocation4], %s30_s8, 0  }
   0x3   :  { %26 = dma.done.wait [#allocation2], 16 }
   0x4   :  { %27 = vsyncadd [#allocation2], 4294967280 }
   0x5   :  { %16 = vsyncmov [#allocation2] }
   0x8   :  { %s17_s13 = vpop.sfrf %16 }
   0x9   :  { %p22_p0 = scmp.ne.s32.totalorder %s17_s13, 0 }
   0xb   :  { %21 = shalt.err (%p22_p0)  }

</bundles_post_ra>
